<compile_context>
chip_gen: v6e
topology: v6e:2x2x1
jax: 0.10.0
libtpu: 0.0.40
codegen_flags: <defaults>
</compile_context>

<pallas_src>
import jax
import jax.numpy as jnp
from jax.experimental import pallas as pl
from jax.experimental.pallas import tpu as pltpu

K_IN = 784        # 28*28 flattened input features (fc1 in); 784 = 98*8 (sublane ok)
H = 128           # fc1 out / fc2 in
N_OUT = 10        # fc2 out (logical)
N_PAD = 128       # lane-dense padded fc2 out


def _round_up(a, b):
    return (a + b - 1) // b * b


def mnist_mlp_kernel(x_ref, w1_ref, b1_ref, w2_ref, b2_ref, o_ref):
    # x arrives f32 (one HBM read); cast to bf16 on the VPU for full-rate MXU.
    x = x_ref[...].astype(w1_ref.dtype)
    # fc1: MXU matmul (bf16 in, f32 acc) + f32 bias + ReLU epilogue on the VPU.
    h = jnp.dot(x, w1_ref[...], preferred_element_type=jnp.float32)
    h = jnp.maximum(h + b1_ref[...], 0.0)
    # fc2: MXU matmul (lane-dense padded N) + bias + sigmoid (EUP exp).
    z = jnp.dot(h.astype(w2_ref.dtype), w2_ref[...],
                preferred_element_type=jnp.float32)
    o_ref[...] = jax.nn.sigmoid(z + b2_ref[...]).astype(o_ref.dtype)


def prepare_params(w1, b1, w2, b2, compute_dtype=jnp.bfloat16):
    """One-time parameter prep (hoisted out of the per-call wrapper).

    PyTorch nn.Linear layout in:  w1 (128, 784), b1 (128,), w2 (10, 128), b2 (10,).
    Out: weights transposed to (in, out), fc2 N padded 10->128 with zero columns,
    cast to the MXU compute dtype; biases kept f32 for the VPU/EUP epilogue.
    """
    w1t = jnp.asarray(w1, jnp.float32).T                                  # (784, 128)
    w2t = jnp.zeros((H, N_PAD), jnp.float32).at[:, :N_OUT].set(
        jnp.asarray(w2, jnp.float32).T)                                   # (128, 128)
    b1r = jnp.asarray(b1, jnp.float32).reshape(1, H)
    b2r = jnp.zeros((1, N_PAD), jnp.float32).at[0, :N_OUT].set(
        jnp.asarray(b2, jnp.float32))
    return (w1t.astype(compute_dtype), b1r, w2t.astype(compute_dtype), b2r)


def mnist_forward(x_nchw, params, *, block_b=512):
    """x_nchw: (B, 1, 28, 28) float32.  params: output of prepare_params()."""
    w1t, b1r, w2t, b2r = params
    B = x_nchw.shape[0]
    x2d = x_nchw.reshape(B, -1)                      # torch.flatten(x, 1) — a view

    # Batch tile: multiple of 8 sublanes, capped so the (tb, 784) f32 x tile
    # double-buffers comfortably inside every generation's scoped VMEM
    # (tb=512 -> ~1.5 MiB per x buffer, ~3 MiB double-buffered).
    tb = min(block_b, _round_up(B, 8))
    b_pad = _round_up(B, tb)
    if b_pad != B:
        # Only copies when the tile does not divide the batch (tiny for B=2).
        xp = jnp.zeros((b_pad, K_IN), x2d.dtype).at[:B, :].set(x2d)
    else:
        xp = x2d

    cost = pl.CostEstimate(
        flops=2 * b_pad * (K_IN * H + H * N_PAD),
        transcendentals=b_pad * N_PAD,                       # sigmoid
        bytes_accessed=(xp.size * xp.dtype.itemsize
                        + w1t.size * w1t.dtype.itemsize
                        + w2t.size * w2t.dtype.itemsize
                        + (b1r.size + b2r.size) * 4
                        + b_pad * N_PAD * 4),
    )

    out = pl.pallas_call(
        mnist_mlp_kernel,
        out_shape=jax.ShapeDtypeStruct((b_pad, N_PAD), jnp.float32),
        grid=(b_pad // tb,),
        in_specs=[
            pl.BlockSpec((tb, K_IN), lambda i: (i, 0)),      # x: batch-tiled, pipelined
            pl.BlockSpec((K_IN, H), lambda i: (0, 0)),       # w1: VMEM-resident
            pl.BlockSpec((1, H), lambda i: (0, 0)),          # b1: VMEM-resident
            pl.BlockSpec((H, N_PAD), lambda i: (0, 0)),      # w2: VMEM-resident
            pl.BlockSpec((1, N_PAD), lambda i: (0, 0)),      # b2: VMEM-resident
        ],
        out_specs=pl.BlockSpec((tb, N_PAD), lambda i: (i, 0)),
        compiler_params=pltpu.CompilerParams(
            dimension_semantics=("parallel",)),              # 2-core sharding on v7x
        cost_estimate=cost,
    )(xp, w1t, b1r, w2t, b2r)

    # Drop batch padding and the zero-padded output lanes.
    return out[:B, :N_OUT]


def init_params(key):
    """Deterministic init matching nn.Linear shapes (out, in), U(-1/sqrt(fan_in), +)."""
    k1, k2, k3, k4 = jax.random.split(key, 4)
    lim1 = 1.0 / jnp.sqrt(784.0)
    lim2 = 1.0 / jnp.sqrt(128.0)
    w1 = jax.random.uniform(k1, (128, 784), jnp.float32, -lim1, lim1)
    b1 = jax.random.uniform(k2, (128,), jnp.float32, -lim1, lim1)
    w2 = jax.random.uniform(k3, (10, 128), jnp.float32, -lim2, lim2)
    b2 = jax.random.uniform(k4, (10,), jnp.float32, -lim2, lim2)
    return w1, b1, w2, b2


if __name__ == "__main__":
    key = jax.random.PRNGKey(0)
    kx, kp = jax.random.split(key)
    # Small batch of MNIST-shaped inputs (NCHW); 784 features fixed by fc1.
    x = jax.random.normal(kx, (2, 1, 28, 28), jnp.float32)
    w1, b1, w2, b2 = init_params(kp)

    params = prepare_params(w1, b1, w2, b2)      # transpose/pad/cast once
    out = mnist_forward(x, params)
    out = jax.block_until_ready(out)

    # Pure-JAX f32 reference (kernel matmuls run bf16 -> modest tolerance).
    x2d = x.reshape(x.shape[0], -1)
    ref = jax.nn.sigmoid(jnp.maximum(x2d @ w1.T + b1, 0.0) @ w2.T + b2)
    assert out.shape == (2, 10)
    err = jnp.max(jnp.abs(out - ref))
    assert jnp.allclose(out, ref, atol=2e-2, rtol=2e-2), f"max abs err {err}"

    print("KERNEL_OK")
</pallas_src>

<mosaic_0001>
module attributes {stable_mosaic.version = 11 : i64} {
  func.func @mnist_mlp_kernel(%arg0: i32, %arg1: memref<8x784xf32, #tpu.memory_space<vmem>>, %arg2: memref<784x128xbf16, #tpu.memory_space<vmem>>, %arg3: memref<1x128xf32, #tpu.memory_space<vmem>>, %arg4: memref<128x128xbf16, #tpu.memory_space<vmem>>, %arg5: memref<1x128xf32, #tpu.memory_space<vmem>>, %arg6: memref<8x128xf32, #tpu.memory_space<vmem>>) attributes {dimension_semantics = [#tpu.dimension_semantics<parallel>], iteration_bounds = array<i64: 1>, scalar_prefetch = 0 : i64, scratch_operands = 0 : i64, tpu.core_type = #tpu.core_type<tc>, window_params = [{transform_indices = @transform_0, window_bounds = array<i64: 8, 784>}, {pipeline_mode = #tpu.pipeline_mode<synchronous>, transform_indices = @transform_1, window_bounds = array<i64: 784, 128>}, {pipeline_mode = #tpu.pipeline_mode<synchronous>, transform_indices = @transform_2, window_bounds = array<i64: 1, 128>}, {pipeline_mode = #tpu.pipeline_mode<synchronous>, transform_indices = @transform_3, window_bounds = array<i64: 128, 128>}, {pipeline_mode = #tpu.pipeline_mode<synchronous>, transform_indices = @transform_4, window_bounds = array<i64: 1, 128>}, {transform_indices = @transform_5, window_bounds = array<i64: 8, 128>}]} {
    %c0 = arith.constant 0 : index
    %c0_0 = arith.constant 0 : index
    %0 = vector.load %arg1[%c0, %c0_0] : memref<8x784xf32, #tpu.memory_space<vmem>>, vector<8x784xf32>
    %1 = arith.truncf %0 : vector<8x784xf32> to vector<8x784xbf16>
    %c0_1 = arith.constant 0 : index
    %c0_2 = arith.constant 0 : index
    %2 = vector.load %arg2[%c0_1, %c0_2] : memref<784x128xbf16, #tpu.memory_space<vmem>>, vector<784x128xbf16>
    %cst = arith.constant dense<0.000000e+00> : vector<8x128xf32>
    %3 = tpu.matmul %1, %2, %cst {dimension_numbers = #tpu.dot_dimension_numbers<[1], [0], [0], [1], [0, 0, 1, 1], [], []>} : vector<8x784xbf16>, vector<784x128xbf16>, vector<8x128xf32> -> vector<8x128xf32>
    %c0_3 = arith.constant 0 : index
    %c0_4 = arith.constant 0 : index
    %4 = vector.load %arg3[%c0_3, %c0_4] : memref<1x128xf32, #tpu.memory_space<vmem>>, vector<1x128xf32>
    %5 = vector.broadcast %4 : vector<1x128xf32> to vector<8x128xf32>
    %6 = arith.addf %3, %5 : vector<8x128xf32>
    %cst_5 = arith.constant 0.000000e+00 : f32
    %7 = vector.broadcast %cst_5 : f32 to vector<8x128xf32>
    %8 = arith.maximumf %6, %7 : vector<8x128xf32>
    %9 = arith.truncf %8 : vector<8x128xf32> to vector<8x128xbf16>
    %c0_6 = arith.constant 0 : index
    %c0_7 = arith.constant 0 : index
    %10 = vector.load %arg4[%c0_6, %c0_7] : memref<128x128xbf16, #tpu.memory_space<vmem>>, vector<128x128xbf16>
    %cst_8 = arith.constant dense<0.000000e+00> : vector<8x128xf32>
    %11 = tpu.matmul %9, %10, %cst_8 {dimension_numbers = #tpu.dot_dimension_numbers<[1], [0], [0], [1], [0, 0, 1, 1], [], []>} : vector<8x128xbf16>, vector<128x128xbf16>, vector<8x128xf32> -> vector<8x128xf32>
    %c0_9 = arith.constant 0 : index
    %c0_10 = arith.constant 0 : index
    %12 = vector.load %arg5[%c0_9, %c0_10] : memref<1x128xf32, #tpu.memory_space<vmem>>, vector<1x128xf32>
    %13 = vector.broadcast %12 : vector<1x128xf32> to vector<8x128xf32>
    %14 = arith.addf %11, %13 : vector<8x128xf32>
    %15 = arith.negf %14 : vector<8x128xf32>
    %16 = math.exp %15 : vector<8x128xf32>
    %cst_11 = arith.constant 1.000000e+00 : f32
    %17 = vector.broadcast %cst_11 : f32 to vector<8x128xf32>
    %18 = arith.addf %17, %16 : vector<8x128xf32>
    %19 = arith.divf %17, %18 : vector<8x128xf32>
    %c0_12 = arith.constant 0 : index
    %c0_13 = arith.constant 0 : index
    %20 = vector.load %arg6[%c0_12, %c0_13] : memref<8x128xf32, #tpu.memory_space<vmem>>, vector<8x128xf32>
    tpu.vector_store %arg6[%c0_12, %c0_13], %19 {strides = array<i32>} : memref<8x128xf32, #tpu.memory_space<vmem>>, vector<8x128xf32>,
    return
  }
  func.func @transform_0(%arg0: i32) -> (i32, i32) {
    %c0_i32 = arith.constant 0 : i32
    %c0_i32_0 = arith.constant 0 : i32
    return %arg0, %c0_i32 : i32, i32
  }
  func.func @transform_1(%arg0: i32) -> (i32, i32) {
    %c0_i32 = arith.constant 0 : i32
    %c0_i32_0 = arith.constant 0 : i32
    %c0_i32_1 = arith.constant 0 : i32
    return %c0_i32, %c0_i32_0 : i32, i32
  }
  func.func @transform_2(%arg0: i32) -> (i32, i32) {
    %c0_i32 = arith.constant 0 : i32
    %c0_i32_0 = arith.constant 0 : i32
    %c0_i32_1 = arith.constant 0 : i32
    return %c0_i32, %c0_i32_0 : i32, i32
  }
  func.func @transform_3(%arg0: i32) -> (i32, i32) {
    %c0_i32 = arith.constant 0 : i32
    %c0_i32_0 = arith.constant 0 : i32
    %c0_i32_1 = arith.constant 0 : i32
    return %c0_i32, %c0_i32_0 : i32, i32
  }
  func.func @transform_4(%arg0: i32) -> (i32, i32) {
    %c0_i32 = arith.constant 0 : i32
    %c0_i32_0 = arith.constant 0 : i32
    %c0_i32_1 = arith.constant 0 : i32
    return %c0_i32, %c0_i32_0 : i32, i32
  }
  func.func @transform_5(%arg0: i32) -> (i32, i32) {
    %c0_i32 = arith.constant 0 : i32
    %c0_i32_0 = arith.constant 0 : i32
    return %arg0, %c0_i32 : i32, i32
  }
}

</mosaic_0001>

<bundles_post_ra>
// kernel: tpu_custom_call.1
= control target key start
LH: loop header
LB: loop body
LE: loop exit
PB: predicated region body
PF: predicated region fallthrough
CT: control target
= control target key end

     0   :  { %10 = vsyncpa [#allocation3], 0  ;;  %s1162_s0 = inlined_call_operand.hbm [shape: f32[8,784], index: 0, kind: input, shape index: {}]   ;;  %s1163_s1 = inlined_call_operand.hbm [shape: bf16[784,128], index: 1, kind: input, shape index: {}]   ;;  %s1164_s2 = inlined_call_operand.vmem [shape: f32[1,128], index: 2, kind: input, shape index: {}]   ;;  %s1165_s3 = inlined_call_operand.hbm [shape: bf16[128,128], index: 3, kind: input, shape index: {}]   ;;  %s1166_s4 = inlined_call_operand.vmem [shape: f32[1,128], index: 4, kind: input, shape index: {}]   ;;  %s1167_s5 = inlined_call_operand.hbm [shape: f32[8,128], index: 5, kind: output, shape index: {}]  }
   0x1   :  { %11 = vsyncpa [#allocation6], 0 }
   0x2   :  { %12 = vsyncpa [#allocation4], 0  ;;  %s1093_s18 = smov [#allocation5]  }
   0x3   :  { %s28_s19 = sshll.u32 %s1093_s18, 4  ;;  %s29_s19 = int_to_ptr.vmem [resolvable:$true] %s28_s19 }
   0x4   :  { %s1015_s20 = scalar_lea.vmem %s29_s19, 6272  ;;  %p1020_p1 = scmp.lt.s32.totalorder %s29_s19, %s29_s19 }
   0x5   :  { %p1016_p0 = scmp.ne.s32.totalorder %s29_s19, %s1015_s20  ;;  %p1021_p2 = scmp.lt.s32.totalorder %s1015_s20, %s1015_s20 }
   0x7   :  { %p1022_p3 = por %p1021_p2, %p1020_p1 }
   0x9   :  { %p1023_p4 = pnand %p1022_p3, %p1016_p0 }
   0xb   :  { %1026 = shalt.err (!%p1023_p4)
}
   0xc   :  { %s1094_s21 = smov 64   ;;  %s1095_s22 = smov 4  }
   0xd   :  { %34 = dma.hbm_to_vmem [thread:$0]  %s1163_s1, 6272, %s29_s19, [#allocation6], %s1094_s21, %s1094_s21, %s1095_s22  }
   0xe   :  { %s1096_s25 = smov [#allocation2]   ;;  %s1097_s27 = smov [#allocation7]  }
   0xf   :  { %s19_s26 = sshll.u32 %s1096_s25, 4  ;;  %s42_s28 = sshll.u32 %s1097_s27, 4  ;;  %s20_s26 = int_to_ptr.vmem [resolvable:$true] %s19_s26  ;;  %s43_s28 = int_to_ptr.vmem [resolvable:$true] %s42_s28 }
  0x10   :  { %s1035_s29 = scalar_lea.vmem %s20_s26, 896  ;;  %p1040_p6 = scmp.lt.s32.totalorder %s20_s26, %s20_s26 }
  0x11   :  { %p1036_p5 = scmp.ne.s32.totalorder %s20_s26, %s1035_s29  ;;  %p1041_p7 = scmp.lt.s32.totalorder %s1035_s29, %s1035_s29 }
  0x13   :  { %p1042_p8 = por %p1041_p7, %p1040_p6 }
  0x15   :  { %p1043_p9 = pnand %p1042_p8, %p1036_p5 }
  0x17   :  { %1046 = shalt.err (!%p1043_p9)
}
  0x18   :  { %22 = dma.hbm_to_vmem [thread:$0]  %s1162_s0, 896, %s20_s26, [#allocation3]  }
  0x19   :  { %s1055_s7 = scalar_lea.vmem %s43_s28, 1024  ;;  %p1060_p11 = scmp.lt.s32.totalorder %s43_s28, %s43_s28 }
  0x1a   :  { %p1056_p10 = scmp.ne.s32.totalorder %s43_s28, %s1055_s7  ;;  %p1061_p12 = scmp.lt.s32.totalorder %s1055_s7, %s1055_s7 }
  0x1c   :  { %p1062_p13 = por %p1061_p12, %p1060_p11 }
  0x1e   :  { %p1063_p0 = pnand %p1062_p13, %p1056_p10 }
  0x20   :  { %1066 = shalt.err (!%p1063_p0)
}
  0x21   :  { %48 = dma.hbm_to_vmem [thread:$0]  %s1165_s3, 1024, %s43_s28, [#allocation6], %s1094_s21, %s1094_s21, %s1095_s22  }
  0x22   :  { %1087 = dma.done.wait [#allocation3], 896  }
  0x23   :  { %1088 = vsyncadd [#allocation3], 4294966400 }
  0x24   :  { %1089 = dma.done.wait [#allocation6], 7296  }
  0x25   :  { %1090 = vsyncadd [#allocation6], 4294960000  ;;  %v946_v0 = vld [vmem:[#allocation5 + $0x78] sm:$0xff]   ;;  %v950_v4 = vld [vmem:[#allocation5 + $0x70] sm:$0xff]   ;;  %v1098_v44 = vmov 0.0   ;;  %vm1099_vm0 = vmmov 0  }
  0x26   :  { %v947_v1 = vld [vmem:[#allocation5 + $0x38] sm:$0xff]   ;;  %835 = vmatprep.subr.bf16.mxu0 %v946_v0  ;;  %v951_v5 = vld [vmem:[#allocation5 + $0x30] sm:$0xff]   ;;  %v954_v8 = vld [vmem:[#allocation5 + $0x68] sm:$0xff]   ;;  %vm474_vm1 = vcmask 130048  }
  0x27   :  { %v948_v2 = vld [vmem:[#allocation5 + $0xf8] sm:$0xff]   ;;  %836 = vmatpush3.bf16.msra.mxu0 %v947_v1  ;;  %v952_v6 = vld [vmem:[#allocation5 + $0xf0] sm:$0xff]   ;;  %v955_v9 = vld [vmem:[#allocation5 + $0x28] sm:$0xff]  }
  0x28   :  { %v949_v3 = vld [vmem:[#allocation5 + $0xb8] sm:$0xff]   ;;  %857 = vmatprep.subr.bf16.mxu1 %v948_v2  ;;  %837 = vmatprep.subr.bf16.mxu0 %v950_v4  ;;  %v953_v7 = vld [vmem:[#allocation5 + $0xb0] sm:$0xff]   ;;  %v956_v10 = vld [vmem:[#allocation5 + $0xe8] sm:$0xff]  }
  0x29   :  { %858 = vmatpush3.bf16.msra.mxu1 %v949_v3  ;;  %v957_v11 = vld [vmem:[#allocation5 + $0xa8] sm:$0xff]   ;;  %v958_v12 = vld [vmem:[#allocation5 + $0x60] sm:$0xff]   ;;  %v962_v16 = vld [vmem:[#allocation5 + $0x58] sm:$0xff]  }
  0x2a   :  { %859 = vmatprep.subr.bf16.mxu1 %v952_v6  ;;  %v959_v13 = vld [vmem:[#allocation5 + $0x20] sm:$0xff]   ;;  %v963_v17 = vld [vmem:[#allocation5 + $0x18] sm:$0xff]   ;;  %v966_v20 = vld [vmem:[#allocation5 + $0x50] sm:$0xff]  }
  0x2b   :  { %838 = vmatpush3.bf16.msra.mxu0 %v951_v5  ;;  %v960_v14 = vld [vmem:[#allocation5 + $0xe0] sm:$0xff]   ;;  %v964_v18 = vld [vmem:[#allocation5 + $0xd8] sm:$0xff]   ;;  %v967_v21 = vld [vmem:[#allocation5 + $0x10] sm:$0xff]  }
  0x2c   :  { %839 = vmatprep.subr.bf16.mxu0 %v954_v8  ;;  %v961_v15 = vld [vmem:[#allocation5 + $0xa0] sm:$0xff]   ;;  %v965_v19 = vld [vmem:[#allocation5 + $0x98] sm:$0xff]   ;;  %v968_v22 = vld [vmem:[#allocation5 + $0xd0] sm:$0xff]  }
  0x2d   :  { %860 = vmatpush3.bf16.msra.mxu1 %v953_v7  ;;  %v969_v23 = vld [vmem:[#allocation5 + $0x90] sm:$0xff]   ;;  %v970_v24 = vld [vmem:[#allocation5 + $0x48] sm:$0xff]   ;;  %v974_v28 = vld [vmem:[#allocation5 + $0x40] sm:$0xff]  }
  0x2e   :  { %861 = vmatprep.subr.bf16.mxu1 %v956_v10  ;;  %v971_v25 = vld [vmem:[#allocation5 + $0x8] sm:$0xff]   ;;  %v975_v29 = vld [vmem:[#allocation5] sm:$0xff]   ;;  %v62_v31 = vld [vmem:[#allocation2 + $0x8] sm:$0xff] }
  0x2f   :  { %840 = vmatpush3.bf16.msra.mxu0 %v955_v9  ;;  %v972_v26 = vld [vmem:[#allocation5 + $0xc8] sm:$0xff]   ;;  %v976_v30 = vld [vmem:[#allocation5 + $0xc0] sm:$0xff]   ;;  %v69_v32 = vpack.c.bf16 %v62_v31, %v62_v31  ;;  %v978_v36 = vld [vmem:[#allocation5 + $0x178] sm:$0xff]  }
  0x30   :  { %841 = vmatprep.subr.bf16.mxu0 %v958_v12  ;;  %v973_v27 = vld [vmem:[#allocation5 + $0x88] sm:$0xff]   ;;  %v977_v33 = vld [vmem:[#allocation5 + $0x80] sm:$0xff]   ;;  %v979_v39 = vld [vmem:[#allocation5 + $0x138] sm:$0xff]  }
  0x31   :  { %862 = vmatpush3.bf16.msra.mxu1 %v957_v11  ;;  %v61_v34 = vld [vmem:[#allocation2] sm:$0xff]  ;;  %v64_v37 = vld [vmem:[#allocation2 + $0x18] sm:$0xff]  ;;  %510 = vmatprep.mubr.bf16.mxu0 %v69_v32  ;;  %v63_v40 = vld [vmem:[#allocation2 + $0x10] sm:$0xff] }
  0x32   :  { %863 = vmatprep.subr.bf16.mxu1 %v960_v14  ;;  %v68_v35 = vpack.c.bf16 %v61_v34, %v61_v34  ;;  %v71_v38 = vpack.c.bf16 %v64_v37, %v64_v37  ;;  %v70_v41 = vpack.c.bf16 %v63_v40, %v63_v40  ;;  %v980_v42 = vld [vmem:[#allocation5 + $0x170] sm:$0xff]   ;;  %v982_v45 = vld [vmem:[#allocation5 + $0x168] sm:$0xff]   ;;  %v984_v47 = vld [vmem:[#allocation5 + $0x160] sm:$0xff]  }
  0x33   :  { %842 = vmatpush3.bf16.msra.mxu0 %v959_v13  ;;  %v981_v43 = vld [vmem:[#allocation5 + $0x130] sm:$0xff]   ;;  %v983_v46 = vld [vmem:[#allocation5 + $0x128] sm:$0xff]   ;;  %v985_v48 = vld [vmem:[#allocation5 + $0x120] sm:$0xff]  }
  0x34   :  { %843 = vmatprep.subr.bf16.mxu0 %v962_v16  ;;  %550 = vmatprep.mubr.bf16.mxu1 %v71_v38  ;;  %v986_v49 = vld [vmem:[#allocation5 + $0x158] sm:$0xff]   ;;  %v988_v51 = vld [vmem:[#allocation5 + $0x150] sm:$0xff]   ;;  %v994_v53 = vld [vmem:[#allocation5 + $0x180] sm:$0xff]  }
  0x35   :  { %864 = vmatpush3.bf16.msra.mxu1 %v961_v15  ;;  %v987_v50 = vld [vmem:[#allocation5 + $0x118] sm:$0xff]   ;;  %v989_v52 = vld [vmem:[#allocation5 + $0x110] sm:$0xff]   ;;  %v990_v55 = vld [vmem:[#allocation5 + $0x148] sm:$0xff]  }
  0x36   :  { %865 = vmatprep.subr.bf16.mxu1 %v964_v18  ;;  %v66_v54 = vld [vmem:[#allocation2 + $0x28] sm:$0xff]  ;;  %v67_v57 = vld [vmem:[#allocation2 + $0x30] sm:$0xff]  ;;  %v991_v59 = vld [vmem:[#allocation5 + $0x108] sm:$0xff]  }
  0x37   :  { %844 = vmatpush3.bf16.msra.mxu0 %v963_v17  ;;  %v73_v56 = vpack.c.bf16 %v66_v54, %v66_v54  ;;  %v74_v58 = vpack.c.bf16 %v67_v57, %v67_v57  ;;  %v992_v60 = vld [vmem:[#allocation5 + $0x140] sm:$0xff]   ;;  %v65_v62 = vld [vmem:[#allocation2 + $0x20] sm:$0xff]  ;;  %v996_v1 = vld [vmem:[#allocation7 + $0x30] sm:$0xff]  }
  0x38   :  { %845 = vmatprep.subr.bf16.mxu0 %v966_v20  ;;  %v993_v61 = vld [vmem:[#allocation5 + $0x100] sm:$0xff]   ;;  %v72_v63 = vpack.c.bf16 %v65_v62, %v65_v62  ;;  %v997_v2 = vld [vmem:[#allocation7 + $0x28] sm:$0xff]   ;;  %v998_v3 = vld [vmem:[#allocation7 + $0x20] sm:$0xff]  }
  0x39   :  { %866 = vmatpush3.bf16.msra.mxu1 %v965_v19  ;;  %v995_v0 = vld [vmem:[#allocation7 + $0x38] sm:$0xff]   ;;  %v1000_v5 = vld [vmem:[#allocation7 + $0x10] sm:$0xff]   ;;  %v1001_v6 = vld [vmem:[#allocation7 + $0x8] sm:$0xff]  }
  0x3a   :  { %867 = vmatprep.subr.bf16.mxu1 %v968_v22  ;;  %v999_v4 = vld [vmem:[#allocation7 + $0x18] sm:$0xff]   ;;  %v1002_v7 = vld [vmem:[#allocation7] sm:$0xff]  }
  0x3b   :  { %846 = vmatpush3.bf16.msra.mxu0 %v967_v21  ;;  %v774_v21 = vld [vmem:[%s1164_s2] ss:$0 sm:$0xff]  ;;  %s1100_s2 = smov [#allocation8]  }
  0x3c   :  { %847 = vmatprep.subr.bf16.mxu0 %v970_v24  ;;  %v825_v34 = vld [vmem:[%s1166_s4] ss:$0 sm:$0xff]  ;;  %s764_s11 = sshll.u32 %s1100_s2, 4  ;;  %s765_s11 = int_to_ptr.vmem [resolvable:$true] %s764_s11 }
  0x3d   :  { %868 = vmatpush3.bf16.msra.mxu1 %v969_v23  ;;  %s1067_s12 = scalar_lea.vmem %s765_s11, 128  ;;  %p1072_p2 = scmp.lt.s32.totalorder %s765_s11, %s765_s11 }
  0x3e   :  { %869 = vmatprep.subr.bf16.mxu1 %v972_v26  ;;  %p1068_p1 = scmp.ne.s32.totalorder %s765_s11, %s1067_s12  ;;  %p1073_p3 = scmp.lt.s32.totalorder %s1067_s12, %s1067_s12 }
  0x3f   :  { %848 = vmatpush3.bf16.msra.mxu0 %v971_v25 }
  0x40   :  { %849 = vmatprep.subr.bf16.mxu0 %v974_v28  ;;  %p1074_p4 = por %p1073_p3, %p1072_p2 }
  0x41   :  { %870 = vmatpush3.bf16.msra.mxu1 %v973_v27 }
  0x42   :  { %871 = vmatprep.subr.bf16.mxu1 %v976_v30  ;;  %p1075_p5 = pnand %p1074_p4, %p1068_p1 }
  0x43   :  { %850 = vmatpush3.bf16.msra.mxu0 %v975_v29 }
  0x44   :  { %879 = vmatprep.subr.bf16.mxu0 %v978_v36 }
  0x45   :  { %872 = vmatpush3.bf16.msra.mxu1 %v977_v33 }
  0x46   :  { %511 = vmatmul.mubr.bf16.vlgmr.msra.gmra.mxu0 %v68_v35  ;;  %912 = vmatprep.subr.bf16.mxu1 %v1098_v44 }
  0x47   :  { %880 = vmatpush3.bf16.msra.mxu0 %v979_v39  ;;  %590 = vmatprep.mubr.bf16.mxu0 %v73_v56 }
  0x48   :  { %551 = vmatmul.mubr.bf16.vlgmr.msra.gmra.mxu1 %v70_v41  ;;  %881 = vmatprep.subr.bf16.mxu0 %v980_v42 }
  0x49   :  { %914 = vmatprep.mubr.msk.bf16.mxu1 %vm1099_vm0, %v1098_v44  ;;  %913 = vmatpush3.bf16.msra.mxu1 %v994_v53 }
  0x4a   :  { %918 = vmatprep.subr.bf16.mxu1 %v1098_v44 }
  0x4b   :  { %882 = vmatpush3.bf16.msra.mxu0 %v981_v43 }
  0x4c   :  { %883 = vmatprep.subr.bf16.mxu0 %v982_v45 }
  0x4f   :  { %884 = vmatpush3.bf16.msra.mxu0 %v983_v46 }
  0x50   :  { %885 = vmatprep.subr.bf16.mxu0 %v984_v47  ;;  %915 = vmatmul.mubr.msk.bf16.vlgmr.msra.gmra.mxu1 %vm474_vm1, %v74_v58 }
  0x51   :  { %934 = vmatprep.mubr.msk.bf16.mxu1 %vm1099_vm0, %v1098_v44  ;;  %919 = vmatpush3.bf16.msra.mxu1 %v995_v0 }
  0x52   :  { %920 = vmatprep.subr.bf16.mxu1 %v1098_v44 }
  0x53   :  { %886 = vmatpush3.bf16.msra.mxu0 %v985_v48 }
  0x54   :  { %887 = vmatprep.subr.bf16.mxu0 %v986_v49 }
  0x55   :  { %921 = vmatpush3.bf16.msra.mxu1 %v996_v1 }
  0x56   :  { %922 = vmatprep.subr.bf16.mxu1 %v1098_v44 }
  0x57   :  { %888 = vmatpush3.bf16.msra.mxu0 %v987_v50 }
  0x58   :  { %889 = vmatprep.subr.bf16.mxu0 %v988_v51 }
  0x59   :  { %923 = vmatpush3.bf16.msra.mxu1 %v997_v2 }
  0x5a   :  { %924 = vmatprep.subr.bf16.mxu1 %v1098_v44 }
  0x5b   :  { %890 = vmatpush3.bf16.msra.mxu0 %v989_v52 }
  0x5c   :  { %891 = vmatprep.subr.bf16.mxu0 %v990_v55 }
  0x5d   :  { %925 = vmatpush3.bf16.msra.mxu1 %v998_v3 }
  0x5e   :  { %926 = vmatprep.subr.bf16.mxu1 %v1098_v44 }
  0x5f   :  { %892 = vmatpush3.bf16.msra.mxu0 %v991_v59 }
  0x60   :  { %893 = vmatprep.subr.bf16.mxu0 %v992_v60 }
  0x61   :  { %927 = vmatpush3.bf16.msra.mxu1 %v999_v4 }
  0x62   :  { %928 = vmatprep.subr.bf16.mxu1 %v1098_v44 }
  0x63   :  { %894 = vmatpush3.bf16.msra.mxu0 %v993_v61 }
  0x65   :  { %929 = vmatpush3.bf16.msra.mxu1 %v1000_v5 }
  0x66   :  { %591 = vmatmul.mubr.bf16.vlgmr.msra.gmra.mxu0 %v72_v63  ;;  %930 = vmatprep.subr.bf16.mxu1 %v1098_v44 }
  0x69   :  { %931 = vmatpush3.bf16.msra.mxu1 %v1001_v6 }
  0x6a   :  { %932 = vmatprep.subr.bf16.mxu1 %v1098_v44 }
  0x6d   :  { %933 = vmatpush3.bf16.msra.mxu1 %v1002_v7 }
 0x106   :  { %v851_v8 = vpop.f32.mrf.mxu0 }
 0x108   :  { %v852_v9 = vpop.f32.mrf.mxu0  ;;  %v873_v10 = vpop.f32.mrf.mxu1 }
 0x109   :  { %v853_v20 = vadd.f32 %v852_v9, %v851_v8 }
 0x10a   :  { %v854_v11 = vpop.f32.mrf.mxu0  ;;  %v874_v12 = vpop.f32.mrf.mxu1 }
 0x10b   :  { %v513_v22 = vadd.f32 %v853_v20, %v774_v21  ;;  %v875_v23 = vadd.f32 %v874_v12, %v873_v10 }
 0x10c   :  { %v855_v13 = vpop.f32.mrf.mxu0  ;;  %v876_v14 = vpop.f32.mrf.mxu1 }
 0x10d   :  { %v553_v26 = vadd.f32 %v875_v23, %v513_v22 }
 0x10e   :  { %v877_v15 = vpop.f32.mrf.mxu1 }
 0x110   :  { %v632_v16 = vpop.f32.mrf.mxu1 }
 0x112   :  { %v916_v17 = vpop.f32.mrf.mxu1 }
 0x114   :  { %v635_v18 = vpop.f32.mrf.mxu1 }
 0x116   :  { %v917_v19 = vpop.f32.mrf.mxu1 }
 0x126   :  { %v895_v24 = vpop.f32.mrf.mxu0 }
 0x128   :  { %v896_v25 = vpop.f32.mrf.mxu0 }
 0x129   :  { %v897_v27 = vadd.f32 %v896_v25, %v895_v24 }
 0x12a   :  { %v898_v28 = vpop.f32.mrf.mxu0 }
 0x12b   :  { %v593_v29 = vadd.f32 %v897_v27, %v553_v26 }
 0x12c   :  { %v899_v30 = vpop.f32.mrf.mxu0 }
 0x12d   :  { %v633_v31 = vadd.f32 %v632_v16, %v593_v29 }
 0x12f   :  { %v638_v32 = vmax.f32 %v633_v31, 0.0 }
 0x131   :  { %v639_v33 = vpack.c.bf16 %v638_v32, %v638_v32 }
 0x133   :  { %935 = vmatmul.mubr.bf16.vlgmr.msra.gmra.mxu1 %v639_v33 }
 0x1f3   :  { %v745_v35 = vpop.f32.mrf.mxu1 }
 0x1f4   :  { %v746_v36 = vadd.f32 %v825_v34, %v745_v35 }
 0x1f5   :  { %v936_v37 = vpop.f32.mrf.mxu1 }
 0x1f6   :  { %v834_v38 = vmul.f32 -1.442695, %v746_v36 }
 0x1f7   :  { %v748_v39 = vpop.f32.mrf.mxu1 }
 0x1f8   :  { %1003 = vpow2.f32 %v834_v38 }
 0x1f9   :  { %v937_v40 = vpop.f32.mrf.mxu1 }
 0x205   :  { %v1004_v41 = vpop.eup %1003 }
 0x206   :  { %v754_v42 = vadd.f32 1.0, %v1004_v41 }
 0x208   :  { %1005 = vrcp.f32 %v754_v42 }
 0x215   :  { %v1006_v43 = vpop.eup %1005 }
 0x216   :  { %757 = vst [vmem:[#allocation8] sm:$0xff] %v1006_v43 }
 0x217   :  { %1078 = shalt.err (!%p1075_p5)
}
 0x218   :  { %767 = dma.vmem_to_hbm [thread:$0]  %s765_s11, 128, %s1167_s5, [#allocation4]  }
 0x219   :  { %1091 = dma.done.wait [#allocation4], 128  }
 0x21a   :  { %1092 = vsyncadd [#allocation4], 4294967168 }
 0x21b   :  { %771 = vsyncpa [#allocation3], 1 }
 0x21c   :  { %772 = vsyncpa [#allocation6], 1 }
 0x21d   :  { %773 = vsyncpa [#allocation4], 1 }

</bundles_post_ra>
